<compile_context>
chip_gen: v7x
topology: tpu7x:2x2x1
jax: 0.10.0
libtpu: 0.0.40
codegen_flags: <defaults>
</compile_context>

<pallas_src>
import jax
import jax.numpy as jnp
from jax.experimental import pallas as pl
from jax.experimental.pallas import tpu as pltpu

_TN = 128  # sequence-axis (lane) tile


def _channel_transpose_kernel(x_ref, w_ref, b_ref, o_ref):
    # x_ref: (1, C, TN)  w_ref: (C, C)  b_ref: (C, 1)  o_ref: (1, C, TN)
    x = x_ref[0]                                                     # (C, TN), n in lanes
    acc = jnp.dot(w_ref[...], x, preferred_element_type=jnp.float32)  # fn == Linear over channels
    o_ref[0] = (acc + b_ref[...] + x).astype(o_ref.dtype)             # + bias + fused residual


def channel_transpose_forward(x, weight, bias, *, tn=_TN):
    """Fused ChannelTranspose(Linear(c, c)) forward.

    x      : (B, C, N) float32
    weight : (C, C) float32   (torch Linear weight, [out, in])
    bias   : (C,)   float32
    returns: (B, C, N) float32
    """
    B, C, N = x.shape
    n_tiles = pl.cdiv(N, tn)
    Np = n_tiles * tn
    if Np != N:
        # explicit zero pad of the ragged tail (padded columns produce finite junk, sliced off below)
        x = jnp.pad(x, ((0, 0), (0, 0), (0, Np - N)))

    w = weight.astype(jnp.float32)                 # (C, C), resident block
    b = bias.astype(jnp.float32).reshape(C, 1)     # (C, 1), broadcasts along lanes

    out = pl.pallas_call(
        _channel_transpose_kernel,
        out_shape=jax.ShapeDtypeStruct((B, C, Np), jnp.float32),
        grid=(B, n_tiles),
        in_specs=[
            pl.BlockSpec((1, C, tn), lambda i, j: (i, 0, j)),   # x: batch x seq-tiled, full channels
            pl.BlockSpec((C, C), lambda i, j: (0, 0)),          # weight: resident
            pl.BlockSpec((C, 1), lambda i, j: (0, 0)),          # bias: resident
        ],
        out_specs=pl.BlockSpec((1, C, tn), lambda i, j: (i, 0, j)),
        compiler_params=pltpu.CompilerParams(
            dimension_semantics=("parallel", "parallel")),
    )(x, w, b)

    return out[:, :, :N]


def _reference(x, weight, bias):
    # Literal translation of the PyTorch module (with fn = Linear) for validation.
    xt = jnp.transpose(x, (0, 2, 1))                       # b c n -> b n c
    out = jnp.einsum("bnc,oc->bno", xt, weight) + bias + xt
    return jnp.transpose(out, (0, 2, 1))                   # b n c -> b c n


if __name__ == "__main__":
    key = jax.random.PRNGKey(0)
    kx, kw, kb = jax.random.split(key, 3)

    B, C, N = 2, 32, 256                                   # (batch, channels, seq)
    x = jax.random.normal(kx, (B, C, N), jnp.float32)
    weight = jax.random.normal(kw, (C, C), jnp.float32) / jnp.sqrt(jnp.float32(C))
    bias = jax.random.normal(kb, (C,), jnp.float32) * 0.1

    fwd = jax.jit(channel_transpose_forward)
    out = fwd(x, weight, bias)
    jax.block_until_ready(out)

    ref = _reference(x, weight, bias)

    assert out.shape == (B, C, N), out.shape
    assert out.dtype == jnp.float32
    assert bool(jnp.all(jnp.isfinite(out)))
    assert bool(jnp.allclose(out, ref, atol=1e-4, rtol=1e-4)), float(jnp.max(jnp.abs(out - ref)))
    print("KERNEL_OK")
</pallas_src>

<mosaic_0001>
module attributes {stable_mosaic.version = 11 : i64} {
  func.func @_channel_transpose_kernel(%arg0: i32, %arg1: i32, %arg2: memref<1x32x128xf32, #tpu.memory_space<vmem>>, %arg3: memref<32x32xf32, #tpu.memory_space<vmem>>, %arg4: memref<32x1xf32, #tpu.memory_space<vmem>>, %arg5: memref<1x32x128xf32, #tpu.memory_space<vmem>>) attributes {dimension_semantics = [#tpu.dimension_semantics<parallel>, #tpu.dimension_semantics<parallel>], iteration_bounds = array<i64: 2, 2>, scalar_prefetch = 0 : i64, scratch_operands = 0 : i64, tpu.core_type = #tpu.core_type<tc>, window_params = [{transform_indices = @transform_0, window_bounds = array<i64: 1, 32, 128>}, {pipeline_mode = #tpu.pipeline_mode<synchronous>, transform_indices = @transform_1, window_bounds = array<i64: 32, 32>}, {pipeline_mode = #tpu.pipeline_mode<synchronous>, transform_indices = @transform_2, window_bounds = array<i64: 32, 1>}, {transform_indices = @transform_3, window_bounds = array<i64: 1, 32, 128>}]} {
    %c0 = arith.constant 0 : index
    %c0_0 = arith.constant 0 : index
    %c0_1 = arith.constant 0 : index
    %0 = vector.load %arg2[%c0, %c0_0, %c0_1] : memref<1x32x128xf32, #tpu.memory_space<vmem>>, vector<1x32x128xf32>
    %1 = vector.shape_cast %0 : vector<1x32x128xf32> to vector<32x128xf32>
    %c0_2 = arith.constant 0 : index
    %c0_3 = arith.constant 0 : index
    %2 = vector.load %arg3[%c0_2, %c0_3] : memref<32x32xf32, #tpu.memory_space<vmem>>, vector<32x32xf32>
    %cst = arith.constant dense<0.000000e+00> : vector<32x128xf32>
    %3 = tpu.matmul %2, %1, %cst {dimension_numbers = #tpu.dot_dimension_numbers<[1], [0], [0], [1], [0, 0, 1, 1], [], []>} : vector<32x32xf32>, vector<32x128xf32>, vector<32x128xf32> -> vector<32x128xf32>
    %c0_4 = arith.constant 0 : index
    %c0_5 = arith.constant 0 : index
    %4 = vector.load %arg4[%c0_4, %c0_5] : memref<32x1xf32, #tpu.memory_space<vmem>>, vector<32x1xf32>
    %5 = vector.broadcast %4 : vector<32x1xf32> to vector<32x128xf32>
    %6 = arith.addf %3, %5 : vector<32x128xf32>
    %7 = arith.addf %6, %1 : vector<32x128xf32>
    %c0_6 = arith.constant 0 : index
    %c0_7 = arith.constant 0 : index
    %c0_8 = arith.constant 0 : index
    %8 = vector.load %arg5[%c0_6, %c0_7, %c0_8] : memref<1x32x128xf32, #tpu.memory_space<vmem>>, vector<1x32x128xf32>
    %9 = vector.shape_cast %8 : vector<1x32x128xf32> to vector<32x128xf32>
    %10 = vector.shape_cast %7 : vector<32x128xf32> to vector<1x32x128xf32>
    tpu.vector_store %arg5[%c0_6, %c0_7, %c0_8], %10 {strides = array<i32>} : memref<1x32x128xf32, #tpu.memory_space<vmem>>, vector<1x32x128xf32>,
    return
  }
  func.func @transform_0(%arg0: i32, %arg1: i32) -> (i32, i32, i32) {
    %c0_i32 = arith.constant 0 : i32
    %c0_i32_0 = arith.constant 0 : i32
    return %arg0, %c0_i32, %arg1 : i32, i32, i32
  }
  func.func @transform_1(%arg0: i32, %arg1: i32) -> (i32, i32) {
    %c0_i32 = arith.constant 0 : i32
    %c0_i32_0 = arith.constant 0 : i32
    %c0_i32_1 = arith.constant 0 : i32
    return %c0_i32, %c0_i32_0 : i32, i32
  }
  func.func @transform_2(%arg0: i32, %arg1: i32) -> (i32, i32) {
    %c0_i32 = arith.constant 0 : i32
    %c0_i32_0 = arith.constant 0 : i32
    %c0_i32_1 = arith.constant 0 : i32
    return %c0_i32, %c0_i32_0 : i32, i32
  }
  func.func @transform_3(%arg0: i32, %arg1: i32) -> (i32, i32, i32) {
    %c0_i32 = arith.constant 0 : i32
    %c0_i32_0 = arith.constant 0 : i32
    return %arg0, %c0_i32, %arg1 : i32, i32, i32
  }
}

</mosaic_0001>

<bundles_post_ra>
// kernel: channel_transpose_forward.1
= control target key start
LH: loop header
LB: loop body
LE: loop exit
PB: predicated region body
PF: predicated region fallthrough
CT: control target
= control target key end

     0   :  { %8 = vsyncpa [#allocation3], 0  ;;  %s973_s0 = inlined_call_operand.hbm [shape: f32[2,32,256], index: 0, kind: input, shape index: {}]   ;;  %s974_s1 = inlined_call_operand.vmem [shape: f32[32,32], index: 1, kind: input, shape index: {}]   ;;  %s975_s2 = inlined_call_operand.vmem [shape: f32[32,1], index: 2, kind: input, shape index: {}]   ;;  %s976_s3 = inlined_call_operand.hbm [shape: f32[2,32,256], index: 3, kind: output, shape index: {}]  }
   0x1   :  { %10 = vsyncpa [#allocation3 + $0x1], 0 }
   0x2   :  { %11 = vsyncpa [#allocation4], 0 }
   0x3   :  { %13 = vsyncpa [#allocation4 + $0x1], 0  ;;  %s746_s12 = smov 0   ;;  %s748_s13 = smov 0  }
   0x4   :  { %s750_s14 = smov 0   ;;  %s752_s15 = smov 0  }
   0x5   :  { %s754_s16 = smov 0   ;;  %s756_s17 = smov 0  }
   0x6   :  { %s758_s18 = smov 0   ;;  %s760_s19 = smov 0  }
   0x7 LB: > { %s447_s20 = sadd.s32 4294967295, %s715_s19   ;;  %s448_s21 = sadd.s32 4294967294, %s715_s19   ;;  %s715_s19 = sphi %s760_s19, %s19_s19   ;;  %s711_s18 = sphi %s758_s18, %s994_s18   ;;  %s707_s17 = sphi %s756_s17, %s993_s17   ;;  %s703_s16 = sphi %s754_s16, %s992_s16   ;;  %s699_s15 = sphi %s752_s15, %s991_s15   ;;  %s695_s14 = sphi %s750_s14, %s990_s14   ;;  %s691_s13 = sphi %s748_s13, %s989_s13   ;;  %s687_s12 = sphi %s746_s12, %s988_s12  }
   0x8   : > { %s28_s22 = sadd.s32 1, %s707_s17  ;;  %s31_s23 = sadd.s32 1, %s711_s18 }
   0x9   : > { %p29_p0 = scmp.ge.s32.totalorder %s28_s22, 2  ;;  %s40_s24 = sadd.s32 1, %s695_s14 }
   0xa   : > { %p47_p1 = scmp.ne.s32.totalorder %s695_s14, %s691_s13  ;;  %p48_p2 = scmp.eq.s32.totalorder %s715_s19, 0 }
   0xb   : > { %s996_s22 = smov (%p29_p0, %s28_s22), 0  ;;  %s998_s23 = smov (!%p29_p0, %s31_s23), %s711_s18 }
   0xc   : > { %s36_s25 = ssub.s32 %s707_s17, %s996_s22  ;;  %p799_p3 = por %p48_p2, %p47_p1 }
   0xd   : > { %p33_p4 = scmp.ge.s32.totalorder %s998_s23, 2  ;;  %p53_p5 = scmp.ne.s32.totalorder %s691_s13, %s687_s12 }
   0xe   : > { %p54_p6 = scmp.eq.s32.totalorder %s447_s20, 0  ;;  %p121_p7 = scmp.eq.s32.totalorder %s447_s20, 3 }
   0xf   : > { %s1000_s23 = smov (%p33_p4, %s998_s23), 0  ;;  %p127_p10 = scmp.eq.s32.totalorder %s448_s21, 3 }
  0x10   : > { %980 = sst [smem:[#allocation8_spill]] %s1000_s23  ;;  %p807_p8 = por %p54_p6, %p53_p5 }
  0x11   : > { %p811_p9 = por %p121_p7, %p47_p1  ;;  %s35_s29 = ssub.s32 %s711_s18, %s1000_s23 }
  0x12   : > { %s37_s30 = sor.u32 %s36_s25, %s35_s29  ;;  %p817_p12 = por %p127_p10, %p53_p5 }
  0x13   : > { %s982_s28 = scalar_select %p811_p9, 1, 0 }
  0x14   : > { %p38_p11 = scmp.eq.s32.totalorder %s37_s30, 0  ;;  %p512_p13 = scmp.lt.s32.totalorder %s715_s19, 4 }
  0x15   : > { %s983_s4 = scalar_select %p817_p12, 1, 0 }
  0x16   : > { %s153_s5 = sand.u32 1, %s695_s14   ;;  %s452_s8 = sshll.u32 %s711_s18, 3 }
  0x17   : > { %s824_s6 = scalar_select %p38_p11, %s695_s14, %s40_s24  }
  0x18   : > { %s451_s7 = sshll.u32 %s153_s5, 5  ;;  %s162_s9 = sadd.s32 %s707_s17, %s452_s8 }
  0x19   : > { %s157_s10 = scalar_lea.vmem [#allocation2], %s451_s7  ;;  %s453_s20 = sshll.u32 %s162_s9, 7 }
  0x1a   : > { %s165_s11 = sshll.u32 %s157_s10, 4  ;;  %s833_s25 = scalar_lea.hbm %s973_s0, %s453_s20  ;;  %s828_s11 = int_to_ptr.vmem [resolvable:$true] %s165_s11 }
  0x1b   : > { %p837_p0 = pnand %p512_p13, %p799_p3  ;;  %s841_s29 = scalar_lea.sflag [#allocation3], %s153_s5 }
  0x1c   : > { %s587_s30 = scalar_lea.hbm %s833_s25, 512  ;;  %s592_s7 = scalar_lea.hbm %s973_s0, 2048 }
  0x1d   : > { %p588_p1 = scmp.ne.s32.totalorder %s833_s25, %s587_s30  ;;  %p589_p2 = pneg %p837_p0 }
  0x1e   : > { %p593_p3 = scmp.lt.u32.totalorder %s833_s25, %s973_s0  ;;  %p594_p6 = scmp.lt.u32.totalorder %s592_s7, %s587_s30 }
  0x1f   : > { %p590_p4 = pnand %p589_p2, %p588_p1  ;;  %p596_p10 = scmp.lt.u32.totalorder %s587_s30, %s833_s25 }
  0x20   : > { %p595_p7 = por %p594_p6, %p593_p3 }
  0x21   : > { %p591_p5 = pneg %p590_p4 }
  0x22   : > { %p597_p11 = por %p596_p10, %p595_p7 }
  0x24   : > { %p598_p13 = pnand %p597_p11, %p591_p5 }
  0x26   : > { %601 = shalt.err (!%p598_p13)
}
  0x27   : > { %s602_s5 = scalar_lea.vmem %s828_s11, 512  ;;  %s717_s10 = smov [#allocation2]  }
  0x28   : > { %p603_p1 = scmp.ne.s32.totalorder %s828_s11, %s602_s5  ;;  %s607_s20 = sshll.u32 %s717_s10, 4  ;;  %s608_s20 = int_to_ptr.vmem [resolvable:$false] %s607_s20 }
  0x29   : > { %s609_s21 = scalar_lea.vmem %s608_s20, 1024  ;;  %p610_p9 = scmp.lt.s32.totalorder %s828_s11, %s608_s20 }
  0x2a   : > { %p605_p4 = pnand %p603_p1, %p589_p2  ;;  %p611_p3 = scmp.lt.s32.totalorder %s609_s21, %s602_s5 }
  0x2c   : > { %p606_p12 = pneg %p605_p4  ;;  %p612_p6 = por %p611_p3, %p610_p9 }
  0x2e   : > { %p613_p7 = pnand %p612_p6, %p606_p12 }
  0x30   : > { %616 = shalt.err (!%p613_p7)
}
  0x31   : > { %s718_s30 = smov 256   ;;  %s719_s23 = smov 128  }
  0x32   : > { %s720_s26 = smov 8   ;;  %p454_p2 = scmp.ge.s32.totalorder %s715_s19, 1 }
  0x33   : > { %507 = dma.hbm_to_vmem [thread:$0]  (!%p837_p0), %s833_s25, 512, %s828_s11, %s841_s29, %s718_s30, %s719_s23, %s720_s26  }
  0x34   : > { %p173_p5 = scmp.lt.s32.totalorder %s715_s19, 5 }
  0x36   : > { %p174_p10 = pnand %p454_p2, %p173_p5 }
  0x37   : > { %s872_s7 = sand.u32 (!%p174_p10), 1, %s691_s13  }
  0x38   : > { %177 = sbr.rel (%p174_p10) target bundleno = 309 (0x135), region = 32  ;;  %s455_s8 = sshll.u32 (!%p174_p10), %s872_s7, 5 }
  0x39   : > { %s180_s9 = scalar_lea.sflag (!%p174_p10), [#allocation3], %s872_s7  ;;  %s183_s5 = scalar_lea.vmem (!%p174_p10), [#allocation2], %s455_s8 }
  0x3f   : > { %678 = dma.done.wait (%p807_p8), %s180_s9, 512  }
  0x40   : > { %680 = vsyncadd (%p807_p8), %s180_s9, 4294966784  ;;  %v721_v0 = vmov 0   ;;  %vm238_vm0 = vcmask 261120   ;;  %v206_v1 = vld [vmem:[%s183_s5] sm:$0xff]  ;;  %v207_v2 = vld [vmem:[%s183_s5 + $0x8] sm:$0xff]  ;;  %s462_s29 = sshll.u32 %s703_s16, 3 }
  0x41   : > { %586 = vset.pattern.permute.xlu1 %v721_v0  ;;  %585 = vset.pattern.permute.xlu0 %v721_v0  ;;  %v208_v3 = vld [vmem:[%s183_s5 + $0x10] sm:$0xff]  ;;  %v488_v4 = vpack.c.bf16 %v207_v2, %v206_v1  ;;  %v209_v5 = vld [vmem:[%s183_s5 + $0x18] sm:$0xff]  ;;  %v210_v6 = vld [vmem:[%s974_s1] sm:$0xff]  ;;  %s356_s27 = sadd.s32 %s699_s15, %s462_s29  ;;  %s205_s10 = scalar_lea.vmem [#allocation5], %s455_s8 }
  0x42   : > { %v212_v7 = vld [vmem:[%s974_s1 + $0x10] sm:$0xff]  ;;  %v492_v8 = vpack.c.bf16 %v209_v5, %v208_v3  ;;  %482 = vmatprep.mubr.msk.f32.mxu0 %vm238_vm0, %v210_v6  ;;  %v214_v10 = vld [vmem:[%s975_s2] sm:$0xff]  ;;  %v217_v11 = vld [vmem:[%s975_s2 + $0x18] sm:$0xff]  ;;  %s359_s20 = sshll.u32 %s205_s10, 4  ;;  %s463_s21 = sshll.u32 %s356_s27, 7  ;;  %s914_s20 = int_to_ptr.vmem [resolvable:$true] %s359_s20 }
  0x43   : > { %485 = vmatprep.mubr.msk.f32.mxu1 %vm238_vm0, %v212_v7  ;;  %489 = vmatprep.subr.bf16.mxu0 %v488_v4  ;;  %v216_v9 = vld [vmem:[%s975_s2 + $0x10] sm:$0xff]  ;;  %v215_v12 = vld [vmem:[%s975_s2 + $0x8] sm:$0xff]  ;;  %v213_v14 = vld [vmem:[%s974_s1 + $0x18] sm:$0xff]  ;;  %s919_s8 = scalar_lea.hbm %s976_s3, %s463_s21  ;;  %s345_s30 = scalar_lea.sflag [#allocation4], %s872_s7 }
  0x44   : > { %496 = vmatprep.subr.bf16.mxu1 %v488_v4  ;;  %491 = vmatpush3.bf16.msra.mxu0 %v488_v4  ;;  %v211_v13 = vld [vmem:[%s974_s1 + $0x8] sm:$0xff]  ;;  %s617_s23 = scalar_lea.vmem %s914_s20, 512  ;;  %p985_p9 = scmp.ne.s32.totalorder %s982_s28, 0 }
  0x45   : > { %498 = vmatpush3.bf16.msra.mxu1 %v488_v4  ;;  %493 = vmatprep.subr.bf16.mxu0 %v492_v8  ;;  %p618_p8 = scmp.ne.s32.totalorder %s914_s20, %s617_s23  ;;  %s722_s26 = smov [#allocation5]  }
  0x46   : > { %497 = vmatprep.subr.bf16.mxu1 %v492_v8  ;;  %230 = vperm.xlu1 %586, %v216_v9   ;;  %s621_s9 = sshll.u32 %s722_s26, 4  ;;  %s622_s9 = int_to_ptr.vmem [resolvable:$false] %s621_s9 }
  0x47   : > { %220 = vperm.xlu0 %585, %v214_v10   ;;  %p619_p12 = pnand %p618_p8, %p985_p9  ;;  %s623_s5 = scalar_lea.vmem %s622_s9, 1024 }
  0x48   : > { %495 = vmatpush3.bf16.msra.mxu0 %v492_v8  ;;  %p624_p11 = scmp.lt.s32.totalorder %s914_s20, %s622_s9  ;;  %p625_p13 = scmp.lt.s32.totalorder %s623_s5, %s617_s23 }
  0x49   : > { %499 = vmatpush3.bf16.msra.mxu1 %v492_v8  ;;  %p620_p0 = pneg %p619_p12 }
  0x4a   : > { %235 = vperm.xlu1 %586, %v217_v11   ;;  %p626_p1 = por %p625_p13, %p624_p11 }
  0x4b   : > { %225 = vperm.xlu0 %585, %v215_v12   ;;  %483 = vmatmul.mubr.msk.f32.vlgmr.msra.gmra.mrb[0].mxu0 %vm238_vm0, %v211_v13 }
  0x4c   : > { %486 = vmatmul.mubr.msk.f32.vlgmr.msra.gmra.mrb[0].mxu1 %vm238_vm0, %v213_v14  ;;  %p627_p4 = pnand %p626_p1, %p620_p0 }
  0xc5   : > { %v231_v15 = vpop.permute.xlu1 %230 }
  0xc6   : > { %v221_v16 = vpop.permute.xlu0 %220 }
  0xc9   : > { %v236_v17 = vpop.permute.xlu1 %235 }
  0xca   : > { %v226_v18 = vpop.permute.xlu0 %225 }
 0x11e   : > { %v484_v19 = vpop.f32.mrb[0].mxu0 }
 0x11f   : > { %v487_v20 = vpop.f32.mrb[0].mxu1  ;;  %v323_v21 = vadd.f32 %v484_v19, %v226_v18  ;;  %v317_v23 = vpop.f32.mrb[1].mxu0 }
 0x120   : > { %v333_v22 = vadd.f32 %v487_v20, %v236_v17  ;;  %v327_v24 = vpop.f32.mrb[1].mxu1  ;;  %v318_v25 = vadd.f32 %v317_v23, %v221_v16 }
 0x121   : > { %v328_v26 = vadd.f32 %v327_v24, %v231_v15  ;;  %v337_v27 = vadd.f32 %v323_v21, %v207_v2 }
 0x122   : > { %v339_v28 = vadd.f32 %v333_v22, %v209_v5  ;;  %v336_v29 = vadd.f32 %v318_v25, %v206_v1 }
 0x123   : > { %v338_v30 = vadd.f32 %v328_v26, %v208_v3  ;;  %341 = vst [vmem:[%s205_s10 + $0x8] sm:$0xff] %v337_v27 }
 0x124   : > { %343 = vst [vmem:[%s205_s10 + $0x18] sm:$0xff] %v339_v28  ;;  %340 = vst [vmem:[%s205_s10] sm:$0xff] %v336_v29 }
 0x125   : > { %342 = vst [vmem:[%s205_s10 + $0x10] sm:$0xff] %v338_v30 }
 0x126   : > { %630 = shalt.err (!%p627_p4)
}
 0x127   : > { %s631_s11 = scalar_lea.hbm %s919_s8, 512  ;;  %s635_s29 = scalar_lea.hbm %s976_s3, 2048 }
 0x128   : > { %p632_p3 = scmp.ne.s32.totalorder %s919_s8, %s631_s11  ;;  %p636_p2 = scmp.lt.u32.totalorder %s919_s8, %s976_s3 }
 0x129   : > { %p637_p5 = scmp.lt.u32.totalorder %s635_s29, %s631_s11  ;;  %p639_p8 = scmp.lt.u32.totalorder %s631_s11, %s919_s8 }
 0x12a   : > { %p633_p6 = pnand %p632_p3, %p985_p9 }
 0x12b   : > { %p638_p10 = por %p637_p5, %p636_p2 }
 0x12c   : > { %p634_p7 = pneg %p633_p6 }
 0x12d   : > { %p640_p12 = por %p639_p8, %p638_p10 }
 0x12f   : > { %p641_p0 = pnand %p640_p12, %p634_p7 }
 0x131   : > { %644 = shalt.err (!%p641_p0)
}
 0x132   : > { %s723_s21 = smov 128   ;;  %s724_s15 = smov 256  }
 0x133   : > { %s725_s16 = smov 8  }
 0x134   : > { %502 = dma.vmem_to_hbm [thread:$0]  (%p985_p9), %s914_s20, 512, %s919_s8, %s345_s30, %s723_s21, %s724_s15, %s725_s16  }
 0x135 PF: > { %p513_p11 = scmp.ge.s32.totalorder %s715_s19, 2  ;;  %s374_s23 = sand.u32 1, %s687_s12  }
 0x136   : > { %p986_p13 = scmp.ne.s32.totalorder %s983_s4, 0  ;;  %s375_s26 = scalar_lea.sflag [#allocation4], %s374_s23 }
 0x138   : > { %p509_p1 = pnand %p513_p11, %p986_p13 }
 0x13a   : > { %682 = dma.done.wait (!%p509_p1), %s375_s26, 512  }
 0x13b   : > { %684 = vsyncadd (!%p509_p1), %s375_s26, 4294966784  ;;  %s19_s19 = sadd.s32 1, %s715_s19   ;;  %s987_s28 = sld [smem:[#allocation8_spill]] }
 0x13c   : > { %p16_p4 = scmp.ge.s32.totalorder %s19_s19, 6   ;;  %s988_s12 = smov %s691_s13 }
 0x13d   : > { %s989_s13 = smov %s695_s14  ;;  %s990_s14 = smov %s824_s6 }
 0x13e   : > { %s991_s15 = smov %s707_s17  ;;  %s992_s16 = smov %s711_s18 }
 0x13f   : > { %s993_s17 = smov %s996_s22  ;;  %18 = sbr.rel (!%p16_p4) target bundleno = 7 (0x7), region = 77 }
 0x141   : > { %s994_s18 = smov %s987_s28 }
 0x146   :  { %380 = vsyncpa [#allocation3], 1 }
 0x147   :  { %382 = vsyncpa [#allocation3 + $0x1], 1 }
 0x148   :  { %383 = vsyncpa [#allocation4], 1 }
 0x149   :  { %385 = vsyncpa [#allocation4 + $0x1], 1 }

</bundles_post_ra>
